<compile_context>
chip_gen: v6e
topology: v6e:2x2x1
jax: 0.10.0
libtpu: 0.0.40
codegen_flags: <defaults>
</compile_context>

<pallas_src>
import math

import jax
import jax.numpy as jnp
from jax.experimental import pallas as pl
from jax.experimental.pallas import tpu as pltpu


def _round_up(n, m):
    return ((n + m - 1) // m) * m


# ---------------------------------------------------------------------------
# Kernels
# ---------------------------------------------------------------------------
def ffn_resident_kernel(x_ref, w1_ref, b1_ref, w2_ref, b2_ref, o_ref):
    """Fast path: full d_ff per step; weights VMEM-resident via constant index maps."""
    # x_ref:  (tm, dm_p)    bf16
    # w1_ref: (dm_p, d_ff)  bf16      b1_ref: (1, d_ff)  f32
    # w2_ref: (d_ff, dm_p)  bf16      b2_ref: (1, dm_p)  f32
    # o_ref:  (tm, dm_p)    x dtype
    h = jnp.dot(x_ref[...], w1_ref[...], preferred_element_type=jnp.float32)
    h = jnp.maximum(h + b1_ref[...], 0.0)                 # bias + ReLU in f32
    # dropout == identity (eval mode)
    out = jnp.dot(h.astype(w2_ref.dtype), w2_ref[...],
                  preferred_element_type=jnp.float32)
    o_ref[...] = (out + b2_ref[...]).astype(o_ref.dtype)


def ffn_tiled_kernel(x_ref, w1_ref, b1_ref, w2_ref, b2_ref, o_ref, acc_ref):
    """Fallback: d_ff tiled on an 'arbitrary' grid axis with an f32 VMEM accumulator."""
    f = pl.program_id(1)

    @pl.when(f == 0)
    def _():
        acc_ref[...] = jnp.zeros_like(acc_ref)

    h = jnp.dot(x_ref[...], w1_ref[...], preferred_element_type=jnp.float32)
    h = jnp.maximum(h + b1_ref[...], 0.0)
    # dropout == identity (eval mode)
    acc_ref[...] += jnp.dot(h.astype(w2_ref.dtype), w2_ref[...],
                            preferred_element_type=jnp.float32)

    @pl.when(f == pl.num_programs(1) - 1)
    def _():
        o_ref[...] = (acc_ref[...] + b2_ref[...]).astype(o_ref.dtype)


# ---------------------------------------------------------------------------
# Wrappers
# ---------------------------------------------------------------------------
def _vmem_limit_bytes():
    """Generation-aware scoped-VMEM limit."""
    try:
        cap = pltpu.get_tpu_info().vmem_capacity_bytes
    except Exception:
        cap = 64 * 1024 * 1024
    if cap <= 64 * 1024 * 1024:       # v7x: 64 MiB physical -> leave Mosaic headroom
        return 48 * 1024 * 1024
    return 100 * 1024 * 1024          # v5e / v6e: 128 MiB physical, 16/32 MiB default


def _pick_tf(d_ff):
    # Lane-aligned d_ff chunk for the fallback path; fall back to full d_ff.
    for cand in (1024, 512, 256, 128):
        if d_ff % cand == 0:
            return cand
    return d_ff


def prepare_ffn_params(w1, b1, w2, b2, *, compute_dtype=jnp.bfloat16):
    """One-time weight preprocessing: pad d_model to a multiple of 128 (lane-dense
    output stores), transpose to matmul layout, cast to the compute dtype.

    Call once at model init, NOT per forward pass.
    w1: [d_ff, d_model]  b1: [d_ff]  w2: [d_model, d_ff]  b2: [d_model]
    (PyTorch nn.Linear conventions.)
    """
    d_ff, d_model = w1.shape
    dm_p = _round_up(d_model, 128)
    pad = dm_p - d_model
    w1_t = jnp.pad(w1, ((0, 0), (0, pad))).T.astype(compute_dtype)   # [dm_p, d_ff]
    w2_t = jnp.pad(w2, ((0, pad), (0, 0))).T.astype(compute_dtype)   # [d_ff, dm_p]
    b1_2d = b1.reshape(1, d_ff).astype(jnp.float32)
    b2_2d = jnp.pad(b2, (0, pad)).reshape(1, dm_p).astype(jnp.float32)
    return w1_t, b1_2d, w2_t, b2_2d


def feed_forward_prepared(x, w1_t, b1_2d, w2_t, b2_2d, *, tm=512,
                          compute_dtype=jnp.bfloat16):
    """x: [..., d_model]; weights from prepare_ffn_params()."""
    d_model = x.shape[-1]
    dm_p, d_ff = w1_t.shape
    N = math.prod(x.shape[:-1])

    c_bytes = jnp.dtype(compute_dtype).itemsize
    o_bytes = jnp.dtype(x.dtype).itemsize
    vmem_limit = _vmem_limit_bytes()

    # Row tiling: big tiles (amortize the ~0.35us/step pipeline overhead), but
    # guarantee >= 2 row tiles when possible so the "parallel" axis can feed both
    # TensorCores on v7x.
    tm_eff = min(tm, _round_up(N, 8))
    Np = _round_up(N, tm_eff)
    if Np // tm_eff < 2 and tm_eff > 8:
        tm_eff = _round_up(tm_eff // 2, 8)
        Np = _round_up(N, tm_eff)

    def _resident_need(tm_):
        return (2 * dm_p * d_ff * c_bytes            # w1 + w2, resident (one copy each)
                + 2 * tm_ * dm_p * c_bytes           # x tiles (double buffered)
                + 2 * tm_ * dm_p * o_bytes           # out tiles (double buffered)
                + tm_ * d_ff * 4 + tm_ * dm_p * 4    # f32 temporaries (h, out)
                + 2 * (d_ff + dm_p) * 4)             # biases

    use_resident = _resident_need(tm_eff) <= int(0.85 * vmem_limit)
    # Resident weights beat a bigger row tile: shrink tm before giving up.
    while not use_resident and tm_eff > 256:
        tm_eff = max(256, _round_up(tm_eff // 2, 8))
        Np = _round_up(N, tm_eff)
        use_resident = _resident_need(tm_eff) <= int(0.85 * vmem_limit)
    n_row_tiles = Np // tm_eff

    x2 = x.reshape(N, d_model).astype(compute_dtype)
    if Np != N or dm_p != d_model:
        x2 = jnp.pad(x2, ((0, Np - N), (0, dm_p - d_model)))

    flops = 4 * Np * dm_p * d_ff   # two matmuls, 2 flops / MAC

    if use_resident:
        cost = pl.CostEstimate(
            flops=flops, transcendentals=0,
            bytes_accessed=(Np * dm_p * c_bytes            # x
                            + 2 * dm_p * d_ff * c_bytes    # w1 + w2, fetched once
                            + (d_ff + dm_p) * 4            # biases
                            + Np * dm_p * o_bytes))        # out
        out = pl.pallas_call(
            ffn_resident_kernel,
            out_shape=jax.ShapeDtypeStruct((Np, dm_p), x.dtype),
            grid_spec=pltpu.PrefetchScalarGridSpec(
                num_scalar_prefetch=0,
                grid=(n_row_tiles,),
                in_specs=[
                    pl.BlockSpec((tm_eff, dm_p), lambda i: (i, 0)),
                    pl.BlockSpec((dm_p, d_ff), lambda i: (0, 0)),   # resident
                    pl.BlockSpec((1, d_ff), lambda i: (0, 0)),
                    pl.BlockSpec((d_ff, dm_p), lambda i: (0, 0)),   # resident
                    pl.BlockSpec((1, dm_p), lambda i: (0, 0)),
                ],
                out_specs=pl.BlockSpec((tm_eff, dm_p), lambda i: (i, 0)),
            ),
            compiler_params=pltpu.CompilerParams(
                dimension_semantics=("parallel",),
                vmem_limit_bytes=vmem_limit),
            cost_estimate=cost,
        )(x2, w1_t, b1_2d, w2_t, b2_2d)
    else:
        tf = _pick_tf(d_ff)
        cost = pl.CostEstimate(
            flops=flops, transcendentals=0,
            bytes_accessed=(Np * dm_p * c_bytes
                            + n_row_tiles * 2 * dm_p * d_ff * c_bytes  # re-streamed weights
                            + (d_ff + dm_p) * 4
                            + Np * dm_p * o_bytes))
        out = pl.pallas_call(
            ffn_tiled_kernel,
            out_shape=jax.ShapeDtypeStruct((Np, dm_p), x.dtype),
            grid_spec=pltpu.PrefetchScalarGridSpec(
                num_scalar_prefetch=0,
                grid=(n_row_tiles, d_ff // tf),
                in_specs=[
                    pl.BlockSpec((tm_eff, dm_p), lambda i, f: (i, 0)),
                    pl.BlockSpec((dm_p, tf), lambda i, f: (0, f)),
                    pl.BlockSpec((1, tf), lambda i, f: (0, f)),
                    pl.BlockSpec((tf, dm_p), lambda i, f: (f, 0)),
                    pl.BlockSpec((1, dm_p), lambda i, f: (0, 0)),
                ],
                out_specs=pl.BlockSpec((tm_eff, dm_p), lambda i, f: (i, 0)),
                scratch_shapes=[pltpu.VMEM((tm_eff, dm_p), jnp.float32)],
            ),
            compiler_params=pltpu.CompilerParams(
                dimension_semantics=("parallel", "arbitrary"),
                vmem_limit_bytes=vmem_limit),
            cost_estimate=cost,
        )(x2, w1_t, b1_2d, w2_t, b2_2d)

    if Np != N or dm_p != d_model:
        out = out[:N, :d_model]
    return out.reshape(x.shape)


def feed_forward(x, w1, b1, w2, b2, *, tm=512, compute_dtype=jnp.bfloat16):
    """Convenience wrapper (prepares weights on the fly). For repeated forward
    passes, call prepare_ffn_params() once and reuse feed_forward_prepared()."""
    params = prepare_ffn_params(w1, b1, w2, b2, compute_dtype=compute_dtype)
    return feed_forward_prepared(x, *params, tm=tm, compute_dtype=compute_dtype)


if __name__ == "__main__":
    # Small shapes consistent with the module: batch=2, seq=8, d_model=32, d_ff=64
    B, S, d_model, d_ff = 2, 8, 32, 64
    key = jax.random.PRNGKey(0)
    kx, k1, k2, k3, k4 = jax.random.split(key, 5)

    x = jax.random.normal(kx, (B, S, d_model), dtype=jnp.float32)

    # nn.Linear-style deterministic init: U(-1/sqrt(fan_in), 1/sqrt(fan_in))
    bnd1 = 1.0 / (d_model ** 0.5)
    w1 = jax.random.uniform(k1, (d_ff, d_model), minval=-bnd1, maxval=bnd1,
                            dtype=jnp.float32)
    b1 = jax.random.uniform(k2, (d_ff,), minval=-bnd1, maxval=bnd1,
                            dtype=jnp.float32)
    bnd2 = 1.0 / (d_ff ** 0.5)
    w2 = jax.random.uniform(k3, (d_model, d_ff), minval=-bnd2, maxval=bnd2,
                            dtype=jnp.float32)
    b2 = jax.random.uniform(k4, (d_model,), minval=-bnd2, maxval=bnd2,
                            dtype=jnp.float32)

    # One-time weight prep (cast / pad / transpose), then the fused kernel.
    params = prepare_ffn_params(w1, b1, w2, b2)
    out = feed_forward_prepared(x, *params)
    out = jax.block_until_ready(out)

    # Pure-JAX f32 reference (eval-mode dropout == identity).
    # Kernel computes in bf16 -> looser tolerance than an all-f32 path.
    ref = jnp.maximum(x @ w1.T + b1, 0.0) @ w2.T + b2
    assert out.shape == (B, S, d_model)
    assert jnp.allclose(out, ref, atol=5e-2, rtol=5e-2), (
        float(jnp.max(jnp.abs(out - ref))))

    print("KERNEL_OK")
</pallas_src>

<mosaic_0001>
module attributes {stable_mosaic.version = 11 : i64} {
  func.func @ffn_resident_kernel(%arg0: i32, %arg1: memref<8x128xbf16, #tpu.memory_space<vmem>>, %arg2: memref<128x64xbf16, #tpu.memory_space<vmem>>, %arg3: memref<1x64xf32, #tpu.memory_space<vmem>>, %arg4: memref<64x128xbf16, #tpu.memory_space<vmem>>, %arg5: memref<1x128xf32, #tpu.memory_space<vmem>>, %arg6: memref<8x128xf32, #tpu.memory_space<vmem>>) attributes {dimension_semantics = [#tpu.dimension_semantics<parallel>], iteration_bounds = array<i64: 2>, scalar_prefetch = 0 : i64, scratch_operands = 0 : i64, tpu.core_type = #tpu.core_type<tc>, window_params = [{transform_indices = @transform_0, window_bounds = array<i64: 8, 128>}, {pipeline_mode = #tpu.pipeline_mode<synchronous>, transform_indices = @transform_1, window_bounds = array<i64: 128, 64>}, {pipeline_mode = #tpu.pipeline_mode<synchronous>, transform_indices = @transform_2, window_bounds = array<i64: 1, 64>}, {pipeline_mode = #tpu.pipeline_mode<synchronous>, transform_indices = @transform_3, window_bounds = array<i64: 64, 128>}, {pipeline_mode = #tpu.pipeline_mode<synchronous>, transform_indices = @transform_4, window_bounds = array<i64: 1, 128>}, {transform_indices = @transform_5, window_bounds = array<i64: 8, 128>}]} {
    %c0 = arith.constant 0 : index
    %c0_0 = arith.constant 0 : index
    %0 = vector.load %arg1[%c0, %c0_0] : memref<8x128xbf16, #tpu.memory_space<vmem>>, vector<8x128xbf16>
    %c0_1 = arith.constant 0 : index
    %c0_2 = arith.constant 0 : index
    %1 = vector.load %arg2[%c0_1, %c0_2] : memref<128x64xbf16, #tpu.memory_space<vmem>>, vector<128x64xbf16>
    %cst = arith.constant dense<0.000000e+00> : vector<8x64xf32>
    %2 = tpu.matmul %0, %1, %cst {dimension_numbers = #tpu.dot_dimension_numbers<[1], [0], [0], [1], [0, 0, 1, 1], [], []>} : vector<8x128xbf16>, vector<128x64xbf16>, vector<8x64xf32> -> vector<8x64xf32>
    %c0_3 = arith.constant 0 : index
    %c0_4 = arith.constant 0 : index
    %3 = vector.load %arg3[%c0_3, %c0_4] : memref<1x64xf32, #tpu.memory_space<vmem>>, vector<1x64xf32>
    %4 = vector.broadcast %3 : vector<1x64xf32> to vector<8x64xf32>
    %5 = arith.addf %2, %4 : vector<8x64xf32>
    %cst_5 = arith.constant 0.000000e+00 : f32
    %6 = vector.broadcast %cst_5 : f32 to vector<8x64xf32>
    %7 = arith.maximumf %5, %6 : vector<8x64xf32>
    %8 = arith.truncf %7 : vector<8x64xf32> to vector<8x64xbf16>
    %c0_6 = arith.constant 0 : index
    %c0_7 = arith.constant 0 : index
    %9 = vector.load %arg4[%c0_6, %c0_7] : memref<64x128xbf16, #tpu.memory_space<vmem>>, vector<64x128xbf16>
    %cst_8 = arith.constant dense<0.000000e+00> : vector<8x128xf32>
    %10 = tpu.matmul %8, %9, %cst_8 {dimension_numbers = #tpu.dot_dimension_numbers<[1], [0], [0], [1], [0, 0, 1, 1], [], []>} : vector<8x64xbf16>, vector<64x128xbf16>, vector<8x128xf32> -> vector<8x128xf32>
    %c0_9 = arith.constant 0 : index
    %c0_10 = arith.constant 0 : index
    %11 = vector.load %arg5[%c0_9, %c0_10] : memref<1x128xf32, #tpu.memory_space<vmem>>, vector<1x128xf32>
    %12 = vector.broadcast %11 : vector<1x128xf32> to vector<8x128xf32>
    %13 = arith.addf %10, %12 : vector<8x128xf32>
    %c0_11 = arith.constant 0 : index
    %c0_12 = arith.constant 0 : index
    %14 = vector.load %arg6[%c0_11, %c0_12] : memref<8x128xf32, #tpu.memory_space<vmem>>, vector<8x128xf32>
    tpu.vector_store %arg6[%c0_11, %c0_12], %13 {strides = array<i32>} : memref<8x128xf32, #tpu.memory_space<vmem>>, vector<8x128xf32>,
    return
  }
  func.func @transform_0(%arg0: i32) -> (i32, i32) {
    %c0_i32 = arith.constant 0 : i32
    %c0_i32_0 = arith.constant 0 : i32
    return %arg0, %c0_i32 : i32, i32
  }
  func.func @transform_1(%arg0: i32) -> (i32, i32) {
    %c0_i32 = arith.constant 0 : i32
    %c0_i32_0 = arith.constant 0 : i32
    %c0_i32_1 = arith.constant 0 : i32
    return %c0_i32, %c0_i32_0 : i32, i32
  }
  func.func @transform_2(%arg0: i32) -> (i32, i32) {
    %c0_i32 = arith.constant 0 : i32
    %c0_i32_0 = arith.constant 0 : i32
    %c0_i32_1 = arith.constant 0 : i32
    return %c0_i32, %c0_i32_0 : i32, i32
  }
  func.func @transform_3(%arg0: i32) -> (i32, i32) {
    %c0_i32 = arith.constant 0 : i32
    %c0_i32_0 = arith.constant 0 : i32
    %c0_i32_1 = arith.constant 0 : i32
    return %c0_i32, %c0_i32_0 : i32, i32
  }
  func.func @transform_4(%arg0: i32) -> (i32, i32) {
    %c0_i32 = arith.constant 0 : i32
    %c0_i32_0 = arith.constant 0 : i32
    %c0_i32_1 = arith.constant 0 : i32
    return %c0_i32, %c0_i32_0 : i32, i32
  }
  func.func @transform_5(%arg0: i32) -> (i32, i32) {
    %c0_i32 = arith.constant 0 : i32
    %c0_i32_0 = arith.constant 0 : i32
    return %arg0, %c0_i32 : i32, i32
  }
}

</mosaic_0001>

<bundles_post_ra>
// kernel: tpu_custom_call.1
= control target key start
LH: loop header
LB: loop body
LE: loop exit
PB: predicated region body
PF: predicated region fallthrough
CT: control target
= control target key end

     0   :  { %10 = vsyncpa [#allocation3], 0  ;;  %s852_s0 = inlined_call_operand.vmem [shape: bf16[16,128], index: 0, kind: input, shape index: {}]   ;;  %s853_s1 = inlined_call_operand.vmem [shape: bf16[128,64], index: 1, kind: input, shape index: {}]   ;;  %s854_s2 = inlined_call_operand.vmem [shape: f32[1,64], index: 2, kind: input, shape index: {}]   ;;  %s855_s3 = inlined_call_operand.vmem [shape: bf16[64,128], index: 3, kind: input, shape index: {}]   ;;  %s856_s4 = inlined_call_operand.vmem [shape: f32[1,128], index: 4, kind: input, shape index: {}]   ;;  %s857_s5 = inlined_call_operand.hbm [shape: f32[16,128], index: 5, kind: output, shape index: {}]  }
   0x1   :  { %12 = vsyncpa [#allocation3 + $0x1], 0  ;;  %s711_s18 = smov 0   ;;  %s713_s19 = smov 0  }
   0x2   :  { %s715_s20 = smov 0   ;;  %s717_s21 = smov 0  }
   0x3 LB: > { %s732_s22 = sadd.s32 4294967295, %s676_s21   ;;  %s492_s23 = sadd.s32 4294967294, %s676_s21   ;;  %s676_s21 = sphi %s717_s21, %s863_s21   ;;  %s672_s20 = sphi %s715_s20, %s862_s20   ;;  %s668_s19 = sphi %s713_s19, %s861_s19   ;;  %s664_s18 = sphi %s711_s18, %s860_s18  }
   0x4   : > { %s736_s24 = sadd.s32 1, %s676_s21   ;;  %s135_s25 = sadd.s32 1, %s672_s20 }
   0x5   : > { %s132_s26 = ssub.s32 %s676_s21, %s736_s24  ;;  %p145_p0 = scmp.ne.s32.totalorder %s672_s20, %s668_s19 }
   0x6   : > { %p133_p1 = scmp.eq.s32.totalorder %s132_s26, 0  ;;  %p146_p2 = scmp.eq.s32.totalorder %s732_s22, 1 }
   0x7   : > { %p151_p3 = scmp.ne.s32.totalorder %s668_s19, %s664_s18  ;;  %p152_p4 = scmp.eq.s32.totalorder %s492_s23, 1 }
   0x8   : > { %s747_s27 = scalar_select %p133_p1, %s672_s20, %s135_s25  }
   0x9   : > { %p749_p5 = por %p146_p2, %p145_p0  ;;  %p753_p6 = por %p152_p4, %p151_p3 }
   0xa   : > { %p495_p7 = scmp.ge.s32.totalorder %s676_s21, 1  ;;  %p189_p8 = scmp.lt.s32.totalorder %s676_s21, 3 }
   0xc   : > { %p190_p9 = pnand %p495_p7, %p189_p8 }
   0xd   : > { %p216_p10 = scmp.lt.s32.totalorder (!%p190_p9), %s732_s22, 1  ;;  %s213_s26 = sand.u32 (!%p190_p9), 1, %s668_s19  }
   0xe   : > { %193 = sbr.rel (%p190_p9) target bundleno = 460 (0x1cc), region = 40  ;;  %s420_s14 = scalar_lea.sflag (!%p190_p9), [#allocation3], %s213_s26 }
  0x13   : > { %v604_v0 = vld [vmem:[%s853_s1 + $0x38] sm:$0xff]   ;;  %v678_v1 = vmov 0.0   ;;  %v605_v2 = vld [vmem:[%s853_s1 + $0x30] sm:$0xff]   ;;  %vm679_vm0 = vmmov 0   ;;  %v606_v3 = vld [vmem:[%s853_s1 + $0x28] sm:$0xff]   ;;  %s217_s30 = scalar_select %p216_p10, %s732_s22, 1 }
  0x14   : > { %531 = vmatprep.subr.bf16.mxu0 %v678_v1  ;;  %551 = vmatprep.subr.bf16.mxu1 %v678_v1  ;;  %v612_v4 = vld [vmem:[%s855_s3 + $0x18] sm:$0xff]   ;;  %v607_v5 = vld [vmem:[%s853_s1 + $0x20] sm:$0xff]   ;;  %v613_v6 = vld [vmem:[%s855_s3 + $0x10] sm:$0xff]   ;;  %vm374_vm1 = vcmask 523264  }
  0x15   : > { %532 = vmatpush3.bf16.msra.mxu0 %v604_v0  ;;  %547 = vmatprep.mubr.msk.bf16.mxu0 %vm679_vm0, %v678_v1  ;;  %v608_v7 = vld [vmem:[%s853_s1 + $0x18] sm:$0xff]   ;;  %v609_v8 = vld [vmem:[%s853_s1 + $0x10] sm:$0xff]   ;;  %v610_v9 = vld [vmem:[%s853_s1 + $0x8] sm:$0xff]   ;;  %s497_s8 = sshll.u32 %s217_s30, 2  ;;  %s496_s30 = sshll.u32 %s213_s26, 3 }
  0x16   : > { %533 = vmatprep.subr.bf16.mxu0 %v678_v1  ;;  %559 = vmatprep.mubr.msk.bf16.mxu1 %vm679_vm0, %v678_v1  ;;  %v611_v10 = vld [vmem:[%s853_s1] sm:$0xff]   ;;  %s219_s13 = scalar_lea.vmem %s852_s0, %s497_s8  ;;  %v614_v12 = vld [vmem:[%s855_s3 + $0x8] sm:$0xff]   ;;  %s514_s8 = sshll.u32 %s732_s22, 7 }
  0x17   : > { %552 = vmatpush3.bf16.msra.mxu1 %v612_v4  ;;  %v221_v11 = vld [vmem:[%s219_s13] sm:$0xf]  ;;  %s215_s9 = scalar_lea.vmem [#allocation2], %s496_s30  ;;  %s811_s13 = scalar_lea.hbm %s857_s5, %s514_s8 }
  0x18   : > { %553 = vmatprep.subr.bf16.mxu1 %v678_v1  ;;  %v615_v13 = vld [vmem:[%s855_s3] sm:$0xff]   ;;  %s433_s10 = sshll.u32 %s215_s9, 4  ;;  %s680_s22 = smov [#allocation2]   ;;  %s813_s10 = int_to_ptr.vmem [resolvable:$true] %s433_s10 }
  0x19   : > { %534 = vmatpush3.bf16.msra.mxu0 %v605_v2  ;;  %v498_v14 = vld [vmem:[%s854_s2] ss:$0 sm:$0xff]  ;;  %s616_s15 = scalar_lea.vmem %s813_s10, 128  ;;  %s620_s16 = sshll.u32 %s680_s22, 4  ;;  %s621_s16 = int_to_ptr.vmem [resolvable:$false] %s620_s16 }
  0x1a   : > { %535 = vmatprep.subr.bf16.mxu0 %v678_v1  ;;  %v507_v22 = vld [vmem:[%s856_s4] ss:$0 sm:$0xff]  ;;  %p617_p11 = scmp.ne.s32.totalorder %s813_s10, %s616_s15  ;;  %s622_s17 = scalar_lea.vmem %s621_s16, 256 }
  0x1b   : > { %554 = vmatpush3.bf16.msra.mxu1 %v613_v6  ;;  %p623_p0 = scmp.lt.s32.totalorder %s813_s10, %s621_s16  ;;  %p624_p1 = scmp.lt.s32.totalorder %s622_s17, %s616_s15 }
  0x1c   : > { %555 = vmatprep.subr.bf16.mxu1 %v678_v1  ;;  %p618_p12 = pnand %p617_p11, %p749_p5 }
  0x1d   : > { %536 = vmatpush3.bf16.msra.mxu0 %v606_v3  ;;  %p625_p2 = por %p624_p1, %p623_p0 }
  0x1e   : > { %537 = vmatprep.subr.bf16.mxu0 %v678_v1  ;;  %p619_p13 = pneg %p618_p12 }
  0x1f   : > { %556 = vmatpush3.bf16.msra.mxu1 %v614_v12 }
  0x20   : > { %557 = vmatprep.subr.bf16.mxu1 %v678_v1  ;;  %p626_p3 = pnand %p625_p2, %p619_p13 }
  0x21   : > { %538 = vmatpush3.bf16.msra.mxu0 %v607_v5 }
  0x22   : > { %539 = vmatprep.subr.bf16.mxu0 %v678_v1 }
  0x23   : > { %558 = vmatpush3.bf16.msra.mxu1 %v615_v13 }
  0x25   : > { %540 = vmatpush3.bf16.msra.mxu0 %v608_v7 }
  0x26   : > { %541 = vmatprep.subr.bf16.mxu0 %v678_v1 }
  0x29   : > { %542 = vmatpush3.bf16.msra.mxu0 %v609_v8 }
  0x2a   : > { %543 = vmatprep.subr.bf16.mxu0 %v678_v1 }
  0x2d   : > { %544 = vmatpush3.bf16.msra.mxu0 %v610_v9 }
  0x2e   : > { %545 = vmatprep.subr.bf16.mxu0 %v678_v1 }
  0x31   : > { %546 = vmatpush3.bf16.msra.mxu0 %v611_v10 }
  0x34   : > { %548 = vmatmul.mubr.bf16.vlgmr.msra.gmra.mxu0 %v221_v11 }
  0xf4   : > { %v327_v15 = vpop.f32.mrf.mxu0 }
  0xf5   : > { %v328_v16 = vadd.f32 %v498_v14, %v327_v15 }
  0xf6   : > { %v549_v17 = vpop.f32.mrf.mxu0 }
  0xf7   : > { %v333_v18 = vmax.f32 %v328_v16, 0.0 }
  0xf8   : > { %v330_v19 = vpop.f32.mrf.mxu0 }
  0xf9   : > { %v334_v20 = vpack.c.bf16 %v333_v18, %v333_v18 }
  0xfa   : > { %v550_v21 = vpop.f32.mrf.mxu0 }
  0xfb   : > { %560 = vmatmul.mubr.msk.bf16.vlgmr.msra.gmra.mxu1 %vm374_vm1, %v334_v20 }
 0x1bb   : > { %v412_v23 = vpop.f32.mrf.mxu1 }
 0x1bc   : > { %v413_v24 = vadd.f32 %v507_v22, %v412_v23 }
 0x1bd   : > { %v561_v25 = vpop.f32.mrf.mxu1 }
 0x1be   : > { %418 = vst [vmem:[%s215_s9] sm:$0xff] %v413_v24 }
 0x1bf   : > { %v415_v26 = vpop.f32.mrf.mxu1 }
 0x1c0   : > { %629 = shalt.err (!%p626_p3)
}
 0x1c1   : > { %s630_s23 = scalar_lea.hbm %s811_s13, 128  ;;  %s634_s30 = scalar_lea.hbm %s857_s5, 256 }
 0x1c2   : > { %p631_p4 = scmp.ne.s32.totalorder %s811_s13, %s630_s23  ;;  %p635_p9 = scmp.lt.s32.totalorder %s811_s13, %s857_s5 }
 0x1c3   : > { %p636_p10 = scmp.lt.s32.totalorder %s634_s30, %s630_s23 }
 0x1c4   : > { %p632_p7 = pnand %p631_p4, %p749_p5 }
 0x1c5   : > { %p637_p11 = por %p636_p10, %p635_p9 }
 0x1c6   : > { %p633_p8 = pneg %p632_p7 }
 0x1c8   : > { %p638_p12 = pnand %p637_p11, %p633_p8 }
 0x1ca   : > { %641 = shalt.err (!%p638_p12)
}
 0x1cb   : > { %563 = dma.vmem_to_hbm [thread:$0]  (%p749_p5), %s813_s10, 128, %s811_s13, %s420_s14   ;;  %v562_v27 = vpop.f32.mrf.mxu1 }
 0x1cc PF: > { %p569_p13 = scmp.ge.s32.totalorder %s676_s21, 2  ;;  %s445_s8 = sand.u32 1, %s664_s18  }
 0x1cd   : > { %s446_s9 = scalar_lea.sflag [#allocation3], %s445_s8 }
 0x1ce   : > { %p566_p0 = pnand %p569_p13, %p753_p6 }
 0x1d0   : > { %p567_p1 = pneg %p566_p0 }
 0x1d2   : > { %659 = dma.done.wait (%p567_p1), %s446_s9, 128  }
 0x1d3   : > { %661 = vsyncadd (%p567_p1), %s446_s9, 4294967168  ;;  %p15_p2 = scmp.ge.s32.totalorder %s736_s24, 4   ;;  %s860_s18 = smov %s668_s19 }
 0x1d4   : > { %s861_s19 = smov %s672_s20  ;;  %s862_s20 = smov %s747_s27 }
 0x1d5   : > { %s863_s21 = smov %s736_s24  ;;  %17 = sbr.rel (!%p15_p2) target bundleno = 3 (0x3), region = 75 }
 0x1da   :  { %451 = vsyncpa [#allocation3], 1 }
 0x1db   :  { %453 = vsyncpa [#allocation3 + $0x1], 1 }

</bundles_post_ra>
